<compile_context>
chip_gen: v5e
topology: v5e:2x2
jax: 0.10.0
libtpu: 0.0.40
codegen_flags: <defaults>
</compile_context>

<pallas_src>
import functools

import jax
import jax.numpy as jnp
from jax.experimental import pallas as pl
from jax.experimental.pallas import tpu as pltpu


def _attention_kernel(g_ref, x_ref, wg_ref, wx_ref, bgx_ref, wp_ref, bp_ref,
                      o_ref, *, use_relu: bool):
    # g_ref : (F_g, TM)    x_ref : (F_l, TM)    o_ref : (F_l, TM)   [io dtype]
    # wg_ref: (F_int, F_g) wx_ref: (F_int, F_l)                     [io dtype]
    # bgx_ref: (F_int, 1) f32   wp_ref: (1, F_int) f32   bp_ref: (1,) f32 SMEM

    # Fused W_g(g) + W_x(x) + (bg + bx).  MXU consumes the I/O-dtype operands
    # directly (bf16 native) and accumulates in f32 -- no VPU pre-casts, no
    # (C, TM) f32 temporaries.
    s = (jnp.dot(wg_ref[...], g_ref[...], preferred_element_type=jnp.float32)
         + jnp.dot(wx_ref[...], x_ref[...], preferred_element_type=jnp.float32)
         + bgx_ref[...])                                      # (F_int, TM) f32

    if use_relu:
        p = jnp.maximum(s, 0.0)
    else:
        p = jnp.maximum(s, 0.1 * s)                           # LeakyReLU(0.1)

    # psi projection: (1, F_int) @ (F_int, TM) -> lane-dense (1, TM), f32.
    psi = jax.nn.sigmoid(
        jnp.dot(wp_ref[...], p, preferred_element_type=jnp.float32) + bp_ref[0])

    # Gate in the I/O dtype: cast only the (1, TM) psi row, not an (F_l, TM)
    # copy of x (f32 multiply only happens naturally on the f32 I/O path).
    o_ref[...] = (x_ref[...] * psi.astype(x_ref.dtype)).astype(o_ref.dtype)


def _fold_bn(conv_w, conv_b, gamma, beta, running_mean, running_var, eps=1e-5):
    """Fold eval-mode BatchNorm2d into a 1x1 conv.

    conv_w: (Cout, Cin) PyTorch-style weight (1x1 kernel squeezed).
    Returns W' with shape (Cout, Cin) ready for W' @ x, and bias (Cout,).
    """
    scale = gamma / jnp.sqrt(running_var + eps)               # (Cout,)
    w_folded = conv_w * scale[:, None]                        # (Cout, Cin)
    b_folded = (conv_b - running_mean) * scale + beta         # (Cout,)
    return w_folded.astype(jnp.float32), b_folded.astype(jnp.float32)


def _round_up(v, m):
    return ((v + m - 1) // m) * m


def _cdiv(a, b):
    return (a + b - 1) // b


def _pad2_bytes(r, c, itemsize):
    """VMEM footprint of a 2-D (r, c) block padded to (8, 128) tiles."""
    return _round_up(r, 8) * _round_up(c, 128) * itemsize


def attention_block(g, x, params, *, use_relu=True, tm=2048, io_dtype=None):
    """g: (N, F_g, H, W), x: (N, F_l, H, W) -> (N, F_l, H, W)  (NCHW, like PyTorch).

    io_dtype defaults to the input dtype; pass bf16 inputs from the producer to
    halve HBM traffic (a wrapper-side cast from f32 is itself an extra HBM pass).
    """
    N, F_g, H, W = g.shape
    _, F_l, _, _ = x.shape
    HW = H * W
    if io_dtype is None:
        io_dtype = g.dtype

    wg, bg = _fold_bn(params["wg"], params["bg"], params["gamma_g"], params["beta_g"],
                      params["rm_g"], params["rv_g"])
    wx, bx = _fold_bn(params["wx"], params["bx"], params["gamma_x"], params["beta_x"],
                      params["rm_x"], params["rv_x"])
    wp, bp = _fold_bn(params["wp"], params["bp"], params["gamma_p"], params["beta_p"],
                      params["rm_p"], params["rv_p"])
    F_int = wg.shape[0]

    # Projection weights in the I/O dtype (MXU takes bf16 natively, f32 accum).
    wg_io = wg.astype(io_dtype)
    wx_io = wx.astype(io_dtype)
    bgx = (bg + bx).reshape(F_int, 1)          # merged projection bias, f32
    bp1 = bp.reshape(1)                        # scalar psi bias -> SMEM, f32

    # NCHW -> (N, C, H*W): pure reshape, no transpose; spatial axis lane-mapped.
    g3 = g.reshape(N, F_g, HW)
    x3 = x.reshape(N, F_l, HW)
    if g3.dtype != io_dtype:
        g3 = g3.astype(io_dtype)               # extra HBM pass; prefer bf16 producer
    if x3.dtype != io_dtype:
        x3 = x3.astype(io_dtype)

    io_item = jnp.dtype(io_dtype).itemsize
    vmem_cap = 56 << 20                        # safely under v7x's 64 MiB physical VMEM

    # Spatial tile: as large as configured, capped by the 128-padded extent.
    tm_eff = int(min(tm, _round_up(HW, 128)))
    tm_eff = max(128, _round_up(tm_eff, 128))

    def _vmem_estimate(t):
        act = 2 * (F_g + 2 * F_l) * t * io_item                      # dbl-buffered I/O blocks
        wts = 2 * (_pad2_bytes(F_int, F_g, io_item)                  # (conservative x2)
                   + _pad2_bytes(F_int, F_l, io_item)
                   + _pad2_bytes(F_int, 1, 4)
                   + _pad2_bytes(1, F_int, 4))
        tmp = 3 * _round_up(F_int, 8) * t * 4                        # s / p / psi f32 temps
        return act + wts + tmp

    # Shrink the tile if the footprint would blow the (v7x-safe) VMEM budget.
    while _vmem_estimate(tm_eff) > vmem_cap and tm_eff > 512:
        tm_eff = max(512, _round_up(tm_eff // 2, 128))

    # Keep both v7x TensorCores busy: ensure >= 2 total grid steps when possible.
    while N * _cdiv(HW, tm_eff) < 2 and tm_eff > 128:
        tm_eff = max(128, _round_up(tm_eff // 2, 128))

    grid = (N, _cdiv(HW, tm_eff))
    vmem_limit = int(min(vmem_cap, max(32 << 20, _vmem_estimate(tm_eff) + (8 << 20))))

    kernel = functools.partial(_attention_kernel, use_relu=use_relu)
    tiled = lambda n, s: (n, 0, s)       # activations / output
    resident = lambda n, s: (0, 0)       # weights / biases stay resident in VMEM

    def _call(weight_mode):
        def wspec(shape):
            return pl.BlockSpec(shape, resident, pipeline_mode=weight_mode)

        return pl.pallas_call(
            kernel,
            out_shape=jax.ShapeDtypeStruct((N, F_l, HW), io_dtype),
            grid_spec=pltpu.PrefetchScalarGridSpec(
                num_scalar_prefetch=0,
                grid=grid,
                in_specs=[
                    pl.BlockSpec((None, F_g, tm_eff), tiled),            # g
                    pl.BlockSpec((None, F_l, tm_eff), tiled),            # x
                    wspec((F_int, F_g)),                                 # Wg (BN folded)
                    wspec((F_int, F_l)),                                 # Wx (BN folded)
                    wspec((F_int, 1)),                                   # bg + bx
                    wspec((1, F_int)),                                   # Wpsi
                    pl.BlockSpec(memory_space=pltpu.MemorySpace.SMEM),   # bpsi scalar
                ],
                out_specs=pl.BlockSpec((None, F_l, tm_eff), tiled),
            ),
            compiler_params=pltpu.CompilerParams(
                dimension_semantics=("parallel", "parallel"),
                vmem_limit_bytes=vmem_limit,
            ),
        )(g3, x3, wg_io, wx_io, bgx, wp, bp1)

    try:
        # Resident weights need only a single VMEM buffer (constant index_map).
        out3 = _call(pl.Buffered(1))
    except Exception:
        out3 = _call(None)

    return out3.reshape(N, F_l, H, W)


def _reference(g, x, params, use_relu=True):
    """Pure-JAX reference mirroring the PyTorch forward (eval-mode BN), NCHW."""
    wg, bg = _fold_bn(params["wg"], params["bg"], params["gamma_g"], params["beta_g"],
                      params["rm_g"], params["rv_g"])
    wx, bx = _fold_bn(params["wx"], params["bx"], params["gamma_x"], params["beta_x"],
                      params["rm_x"], params["rv_x"])
    wp, bp = _fold_bn(params["wp"], params["bp"], params["gamma_p"], params["beta_p"],
                      params["rm_p"], params["rv_p"])
    gf = g.astype(jnp.float32)
    xf = x.astype(jnp.float32)
    g1 = jnp.einsum("oc,nchw->nohw", wg, gf) + bg[None, :, None, None]
    x1 = jnp.einsum("oc,nchw->nohw", wx, xf) + bx[None, :, None, None]
    s = g1 + x1
    p = jnp.maximum(s, 0.0) if use_relu else jnp.where(s >= 0.0, s, 0.1 * s)
    psi = jax.nn.sigmoid(jnp.einsum("oc,nchw->nohw", wp, p) + bp[None, :, None, None])
    return xf * psi


def make_params(key, F_g, F_l, F_int):
    ks = jax.random.split(key, 12)
    u = lambda k, shape, scale: jax.random.uniform(k, shape, jnp.float32, -scale, scale)
    params = {
        # conv weights stored PyTorch-style (Cout, Cin) for 1x1 kernels
        "wg": u(ks[0], (F_int, F_g), 0.5), "bg": u(ks[1], (F_int,), 0.1),
        "wx": u(ks[2], (F_int, F_l), 0.5), "bx": u(ks[3], (F_int,), 0.1),
        "wp": u(ks[4], (1, F_int), 0.5),   "bp": u(ks[5], (1,), 0.1),
        # BatchNorm params + running stats (eval mode)
        "gamma_g": 1.0 + 0.1 * jax.random.normal(ks[6], (F_int,)),
        "beta_g": 0.05 * jax.random.normal(ks[7], (F_int,)),
        "rm_g": 0.1 * jax.random.normal(ks[8], (F_int,)),
        "rv_g": jnp.abs(1.0 + 0.1 * jax.random.normal(ks[9], (F_int,))),
        "gamma_x": 1.0 + 0.1 * jax.random.normal(ks[10], (F_int,)),
        "beta_x": 0.05 * jax.random.normal(ks[11], (F_int,)),
        "rm_x": jnp.zeros((F_int,)) + 0.02,
        "rv_x": jnp.ones((F_int,)) * 1.1,
        "gamma_p": jnp.ones((1,)) * 0.9,
        "beta_p": jnp.ones((1,)) * 0.01,
        "rm_p": jnp.zeros((1,)) + 0.03,
        "rv_p": jnp.ones((1,)) * 0.95,
    }
    return {k: v.astype(jnp.float32) for k, v in params.items()}


if __name__ == "__main__":
    key = jax.random.PRNGKey(0)
    k_g, k_x, k_p = jax.random.split(key, 3)

    N, H, W = 2, 16, 16
    F_g, F_l, F_int = 4, 4, 8

    g = jax.random.normal(k_g, (N, F_g, H, W), jnp.float32)
    x = jax.random.normal(k_x, (N, F_l, H, W), jnp.float32)
    params = make_params(k_p, F_g, F_l, F_int)

    # 1) f32 I/O, ReLU path (strict check).
    out = jax.block_until_ready(attention_block(g, x, params, use_relu=True))
    ref = _reference(g, x, params, use_relu=True)
    assert out.shape == (N, F_l, H, W)
    assert jnp.allclose(out, ref, atol=1e-5, rtol=1e-5), "f32/relu mismatch"

    # 2) LeakyReLU(0.1) path.
    out_l = jax.block_until_ready(attention_block(g, x, params, use_relu=False))
    ref_l = _reference(g, x, params, use_relu=False)
    assert jnp.allclose(out_l, ref_l, atol=1e-5, rtol=1e-5), "f32/leaky mismatch"

    # 3) Non-128-multiple spatial extent exercises the padded/partial last block
    #    (no wrapper-side pad or slice any more).
    g_odd = jax.random.normal(k_g, (N, F_g, 10, 10), jnp.float32)
    x_odd = jax.random.normal(k_x, (N, F_l, 10, 10), jnp.float32)
    out_o = jax.block_until_ready(attention_block(g_odd, x_odd, params, use_relu=True))
    ref_o = _reference(g_odd, x_odd, params, use_relu=True)
    assert jnp.allclose(out_o, ref_o, atol=1e-5, rtol=1e-5), "partial-tile mismatch"

    # 4) bf16 I/O path (halves HBM traffic on every generation; f32 accumulation
    #    inside; producer already supplies bf16 so no wrapper cast pass).
    g_b = g.astype(jnp.bfloat16)
    x_b = x.astype(jnp.bfloat16)
    out_b = jax.block_until_ready(
        attention_block(g_b, x_b, params, use_relu=True, io_dtype=jnp.bfloat16))
    ref_b = _reference(g_b, x_b, params, use_relu=True)
    assert jnp.allclose(out_b.astype(jnp.float32), ref_b, atol=2e-2, rtol=2e-2), \
        "bf16 mismatch"

    print("KERNEL_OK")
</pallas_src>

<mosaic_0001>
module attributes {stable_mosaic.version = 11 : i64} {
  func.func @_attention_kernel(%arg0: i32, %arg1: i32, %arg2: memref<1x4x256xf32, #tpu.memory_space<vmem>>, %arg3: memref<1x4x256xf32, #tpu.memory_space<vmem>>, %arg4: memref<8x4xf32, #tpu.memory_space<vmem>>, %arg5: memref<8x4xf32, #tpu.memory_space<vmem>>, %arg6: memref<8x1xf32, #tpu.memory_space<vmem>>, %arg7: memref<1x8xf32, #tpu.memory_space<vmem>>, %arg8: memref<1xf32, #tpu.memory_space<smem>>, %arg9: memref<1x4x256xf32, #tpu.memory_space<vmem>>) attributes {dimension_semantics = [#tpu.dimension_semantics<parallel>, #tpu.dimension_semantics<parallel>], iteration_bounds = array<i64: 2, 1>, scalar_prefetch = 0 : i64, scratch_operands = 0 : i64, tpu.core_type = #tpu.core_type<tc>, window_params = [{transform_indices = @transform_0, window_bounds = array<i64: 1, 4, 256>}, {transform_indices = @transform_1, window_bounds = array<i64: 1, 4, 256>}, {pipeline_mode = #tpu.pipeline_mode<synchronous>, transform_indices = @transform_2, window_bounds = array<i64: 8, 4>}, {pipeline_mode = #tpu.pipeline_mode<synchronous>, transform_indices = @transform_3, window_bounds = array<i64: 8, 4>}, {pipeline_mode = #tpu.pipeline_mode<synchronous>, transform_indices = @transform_4, window_bounds = array<i64: 8, 1>}, {pipeline_mode = #tpu.pipeline_mode<synchronous>, transform_indices = @transform_5, window_bounds = array<i64: 1, 8>}, {transform_indices = @transform_6, window_bounds = array<i64: 1>}, {transform_indices = @transform_7, window_bounds = array<i64: 1, 4, 256>}]} {
    %c0 = arith.constant 0 : index
    %c0_0 = arith.constant 0 : index
    %0 = vector.load %arg4[%c0, %c0_0] : memref<8x4xf32, #tpu.memory_space<vmem>>, vector<8x4xf32>
    %c0_1 = arith.constant 0 : index
    %c0_2 = arith.constant 0 : index
    %c0_3 = arith.constant 0 : index
    %1 = vector.load %arg2[%c0_1, %c0_2, %c0_3] : memref<1x4x256xf32, #tpu.memory_space<vmem>>, vector<1x4x256xf32>
    %2 = vector.shape_cast %1 : vector<1x4x256xf32> to vector<4x256xf32>
    %cst = arith.constant dense<0.000000e+00> : vector<8x256xf32>
    %3 = tpu.matmul %0, %2, %cst {dimension_numbers = #tpu.dot_dimension_numbers<[1], [0], [0], [1], [0, 0, 1, 1], [], []>} : vector<8x4xf32>, vector<4x256xf32>, vector<8x256xf32> -> vector<8x256xf32>
    %c0_4 = arith.constant 0 : index
    %c0_5 = arith.constant 0 : index
    %4 = vector.load %arg5[%c0_4, %c0_5] : memref<8x4xf32, #tpu.memory_space<vmem>>, vector<8x4xf32>
    %c0_6 = arith.constant 0 : index
    %c0_7 = arith.constant 0 : index
    %c0_8 = arith.constant 0 : index
    %5 = vector.load %arg3[%c0_6, %c0_7, %c0_8] : memref<1x4x256xf32, #tpu.memory_space<vmem>>, vector<1x4x256xf32>
    %6 = vector.shape_cast %5 : vector<1x4x256xf32> to vector<4x256xf32>
    %cst_9 = arith.constant dense<0.000000e+00> : vector<8x256xf32>
    %7 = tpu.matmul %4, %6, %cst_9 {dimension_numbers = #tpu.dot_dimension_numbers<[1], [0], [0], [1], [0, 0, 1, 1], [], []>} : vector<8x4xf32>, vector<4x256xf32>, vector<8x256xf32> -> vector<8x256xf32>
    %8 = arith.addf %3, %7 : vector<8x256xf32>
    %c0_10 = arith.constant 0 : index
    %c0_11 = arith.constant 0 : index
    %9 = vector.load %arg6[%c0_10, %c0_11] : memref<8x1xf32, #tpu.memory_space<vmem>>, vector<8x1xf32>
    %10 = vector.broadcast %9 : vector<8x1xf32> to vector<8x256xf32>
    %11 = arith.addf %8, %10 : vector<8x256xf32>
    %cst_12 = arith.constant 0.000000e+00 : f32
    %12 = vector.broadcast %cst_12 : f32 to vector<8x256xf32>
    %13 = arith.maximumf %11, %12 : vector<8x256xf32>
    %c0_13 = arith.constant 0 : index
    %c0_14 = arith.constant 0 : index
    %14 = vector.load %arg7[%c0_13, %c0_14] : memref<1x8xf32, #tpu.memory_space<vmem>>, vector<1x8xf32>
    %cst_15 = arith.constant dense<0.000000e+00> : vector<1x256xf32>
    %15 = tpu.matmul %14, %13, %cst_15 {dimension_numbers = #tpu.dot_dimension_numbers<[1], [0], [0], [1], [0, 0, 1, 1], [], []>} : vector<1x8xf32>, vector<8x256xf32>, vector<1x256xf32> -> vector<1x256xf32>
    %c0_16 = arith.constant 0 : index
    %16 = memref.load %arg8[%c0_16] : memref<1xf32, #tpu.memory_space<smem>>
    %17 = vector.broadcast %16 : f32 to vector<1x256xf32>
    %18 = arith.addf %15, %17 : vector<1x256xf32>
    %19 = arith.negf %18 : vector<1x256xf32>
    %20 = math.exp %19 : vector<1x256xf32>
    %cst_17 = arith.constant 1.000000e+00 : f32
    %21 = vector.broadcast %cst_17 : f32 to vector<1x256xf32>
    %22 = arith.addf %21, %20 : vector<1x256xf32>
    %23 = arith.divf %21, %22 : vector<1x256xf32>
    %c0_18 = arith.constant 0 : index
    %c0_19 = arith.constant 0 : index
    %c0_20 = arith.constant 0 : index
    %24 = vector.load %arg3[%c0_18, %c0_19, %c0_20] : memref<1x4x256xf32, #tpu.memory_space<vmem>>, vector<1x4x256xf32>
    %25 = vector.shape_cast %24 : vector<1x4x256xf32> to vector<4x256xf32>
    %26 = vector.broadcast %23 : vector<1x256xf32> to vector<4x256xf32>
    %27 = arith.mulf %25, %26 : vector<4x256xf32>
    %c0_21 = arith.constant 0 : index
    %c0_22 = arith.constant 0 : index
    %c0_23 = arith.constant 0 : index
    %28 = vector.load %arg9[%c0_21, %c0_22, %c0_23] : memref<1x4x256xf32, #tpu.memory_space<vmem>>, vector<1x4x256xf32>
    %29 = vector.shape_cast %28 : vector<1x4x256xf32> to vector<4x256xf32>
    %30 = vector.shape_cast %27 : vector<4x256xf32> to vector<1x4x256xf32>
    tpu.vector_store %arg9[%c0_21, %c0_22, %c0_23], %30 {strides = array<i32>} : memref<1x4x256xf32, #tpu.memory_space<vmem>>, vector<1x4x256xf32>,
    return
  }
  func.func @transform_0(%arg0: i32, %arg1: i32) -> (i32, i32, i32) {
    %c0_i32 = arith.constant 0 : i32
    %c0_i32_0 = arith.constant 0 : i32
    return %arg0, %c0_i32, %arg1 : i32, i32, i32
  }
  func.func @transform_1(%arg0: i32, %arg1: i32) -> (i32, i32, i32) {
    %c0_i32 = arith.constant 0 : i32
    %c0_i32_0 = arith.constant 0 : i32
    return %arg0, %c0_i32, %arg1 : i32, i32, i32
  }
  func.func @transform_2(%arg0: i32, %arg1: i32) -> (i32, i32) {
    %c0_i32 = arith.constant 0 : i32
    %c0_i32_0 = arith.constant 0 : i32
    %c0_i32_1 = arith.constant 0 : i32
    return %c0_i32, %c0_i32_0 : i32, i32
  }
  func.func @transform_3(%arg0: i32, %arg1: i32) -> (i32, i32) {
    %c0_i32 = arith.constant 0 : i32
    %c0_i32_0 = arith.constant 0 : i32
    %c0_i32_1 = arith.constant 0 : i32
    return %c0_i32, %c0_i32_0 : i32, i32
  }
  func.func @transform_4(%arg0: i32, %arg1: i32) -> (i32, i32) {
    %c0_i32 = arith.constant 0 : i32
    %c0_i32_0 = arith.constant 0 : i32
    %c0_i32_1 = arith.constant 0 : i32
    return %c0_i32, %c0_i32_0 : i32, i32
  }
  func.func @transform_5(%arg0: i32, %arg1: i32) -> (i32, i32) {
    %c0_i32 = arith.constant 0 : i32
    %c0_i32_0 = arith.constant 0 : i32
    %c0_i32_1 = arith.constant 0 : i32
    return %c0_i32, %c0_i32_0 : i32, i32
  }
  func.func @transform_6(%arg0: i32, %arg1: i32) -> i32 {
    %c0_i32 = arith.constant 0 : i32
    %c0_i32_0 = arith.constant 0 : i32
    return %c0_i32 : i32
  }
  func.func @transform_7(%arg0: i32, %arg1: i32) -> (i32, i32, i32) {
    %c0_i32 = arith.constant 0 : i32
    %c0_i32_0 = arith.constant 0 : i32
    return %arg0, %c0_i32, %arg1 : i32, i32, i32
  }
}

module attributes {stable_mosaic.version = 11 : i64} {
  func.func @_attention_kernel(%arg0: i32, %arg1: i32, %arg2: memref<1x4x256xf32, #tpu.memory_space<vmem>>, %arg3: memref<1x4x256xf32, #tpu.memory_space<vmem>>, %arg4: memref<8x4xf32, #tpu.memory_space<vmem>>, %arg5: memref<8x4xf32, #tpu.memory_space<vmem>>, %arg6: memref<8x1xf32, #tpu.memory_space<vmem>>, %arg7: memref<1x8xf32, #tpu.memory_space<vmem>>, %arg8: memref<1xf32, #tpu.memory_space<smem>>, %arg9: memref<1x4x256xf32, #tpu.memory_space<vmem>>) attributes {dimension_semantics = [#tpu.dimension_semantics<parallel>, #tpu.dimension_semantics<parallel>], iteration_bounds = array<i64: 2, 1>, scalar_prefetch = 0 : i64, scratch_operands = 0 : i64, tpu.core_type = #tpu.core_type<tc>, window_params = [{transform_indices = @transform_0, window_bounds = array<i64: 1, 4, 256>}, {transform_indices = @transform_1, window_bounds = array<i64: 1, 4, 256>}, {pipeline_mode = #tpu.pipeline_mode<synchronous>, transform_indices = @transform_2, window_bounds = array<i64: 8, 4>}, {pipeline_mode = #tpu.pipeline_mode<synchronous>, transform_indices = @transform_3, window_bounds = array<i64: 8, 4>}, {pipeline_mode = #tpu.pipeline_mode<synchronous>, transform_indices = @transform_4, window_bounds = array<i64: 8, 1>}, {pipeline_mode = #tpu.pipeline_mode<synchronous>, transform_indices = @transform_5, window_bounds = array<i64: 1, 8>}, {transform_indices = @transform_6, window_bounds = array<i64: 1>}, {transform_indices = @transform_7, window_bounds = array<i64: 1, 4, 256>}]} {
    %c0 = arith.constant 0 : index
    %c0_0 = arith.constant 0 : index
    %0 = vector.load %arg4[%c0, %c0_0] : memref<8x4xf32, #tpu.memory_space<vmem>>, vector<8x4xf32>
    %c0_1 = arith.constant 0 : index
    %c0_2 = arith.constant 0 : index
    %c0_3 = arith.constant 0 : index
    %1 = vector.load %arg2[%c0_1, %c0_2, %c0_3] : memref<1x4x256xf32, #tpu.memory_space<vmem>>, vector<1x4x256xf32>
    %2 = vector.shape_cast %1 : vector<1x4x256xf32> to vector<4x256xf32>
    %cst = arith.constant dense<0.000000e+00> : vector<8x256xf32>
    %3 = tpu.matmul %0, %2, %cst {dimension_numbers = #tpu.dot_dimension_numbers<[1], [0], [0], [1], [0, 0, 1, 1], [], []>} : vector<8x4xf32>, vector<4x256xf32>, vector<8x256xf32> -> vector<8x256xf32>
    %c0_4 = arith.constant 0 : index
    %c0_5 = arith.constant 0 : index
    %4 = vector.load %arg5[%c0_4, %c0_5] : memref<8x4xf32, #tpu.memory_space<vmem>>, vector<8x4xf32>
    %c0_6 = arith.constant 0 : index
    %c0_7 = arith.constant 0 : index
    %c0_8 = arith.constant 0 : index
    %5 = vector.load %arg3[%c0_6, %c0_7, %c0_8] : memref<1x4x256xf32, #tpu.memory_space<vmem>>, vector<1x4x256xf32>
    %6 = vector.shape_cast %5 : vector<1x4x256xf32> to vector<4x256xf32>
    %cst_9 = arith.constant dense<0.000000e+00> : vector<8x256xf32>
    %7 = tpu.matmul %4, %6, %cst_9 {dimension_numbers = #tpu.dot_dimension_numbers<[1], [0], [0], [1], [0, 0, 1, 1], [], []>} : vector<8x4xf32>, vector<4x256xf32>, vector<8x256xf32> -> vector<8x256xf32>
    %8 = arith.addf %3, %7 : vector<8x256xf32>
    %c0_10 = arith.constant 0 : index
    %c0_11 = arith.constant 0 : index
    %9 = vector.load %arg6[%c0_10, %c0_11] : memref<8x1xf32, #tpu.memory_space<vmem>>, vector<8x1xf32>
    %10 = vector.broadcast %9 : vector<8x1xf32> to vector<8x256xf32>
    %11 = arith.addf %8, %10 : vector<8x256xf32>
    %cst_12 = arith.constant 0.000000e+00 : f32
    %12 = vector.broadcast %cst_12 : f32 to vector<8x256xf32>
    %13 = arith.maximumf %11, %12 : vector<8x256xf32>
    %c0_13 = arith.constant 0 : index
    %c0_14 = arith.constant 0 : index
    %14 = vector.load %arg7[%c0_13, %c0_14] : memref<1x8xf32, #tpu.memory_space<vmem>>, vector<1x8xf32>
    %cst_15 = arith.constant dense<0.000000e+00> : vector<1x256xf32>
    %15 = tpu.matmul %14, %13, %cst_15 {dimension_numbers = #tpu.dot_dimension_numbers<[1], [0], [0], [1], [0, 0, 1, 1], [], []>} : vector<1x8xf32>, vector<8x256xf32>, vector<1x256xf32> -> vector<1x256xf32>
    %c0_16 = arith.constant 0 : index
    %16 = memref.load %arg8[%c0_16] : memref<1xf32, #tpu.memory_space<smem>>
    %17 = vector.broadcast %16 : f32 to vector<1x256xf32>
    %18 = arith.addf %15, %17 : vector<1x256xf32>
    %19 = arith.negf %18 : vector<1x256xf32>
    %20 = math.exp %19 : vector<1x256xf32>
    %cst_17 = arith.constant 1.000000e+00 : f32
    %21 = vector.broadcast %cst_17 : f32 to vector<1x256xf32>
    %22 = arith.addf %21, %20 : vector<1x256xf32>
    %23 = arith.divf %21, %22 : vector<1x256xf32>
    %c0_18 = arith.constant 0 : index
    %c0_19 = arith.constant 0 : index
    %c0_20 = arith.constant 0 : index
    %24 = vector.load %arg3[%c0_18, %c0_19, %c0_20] : memref<1x4x256xf32, #tpu.memory_space<vmem>>, vector<1x4x256xf32>
    %25 = vector.shape_cast %24 : vector<1x4x256xf32> to vector<4x256xf32>
    %26 = vector.broadcast %23 : vector<1x256xf32> to vector<4x256xf32>
    %27 = arith.mulf %25, %26 : vector<4x256xf32>
    %c0_21 = arith.constant 0 : index
    %c0_22 = arith.constant 0 : index
    %c0_23 = arith.constant 0 : index
    %28 = vector.load %arg9[%c0_21, %c0_22, %c0_23] : memref<1x4x256xf32, #tpu.memory_space<vmem>>, vector<1x4x256xf32>
    %29 = vector.shape_cast %28 : vector<1x4x256xf32> to vector<4x256xf32>
    %30 = vector.shape_cast %27 : vector<4x256xf32> to vector<1x4x256xf32>
    tpu.vector_store %arg9[%c0_21, %c0_22, %c0_23], %30 {strides = array<i32>} : memref<1x4x256xf32, #tpu.memory_space<vmem>>, vector<1x4x256xf32>,
    return
  }
  func.func @transform_0(%arg0: i32, %arg1: i32) -> (i32, i32, i32) {
    %c0_i32 = arith.constant 0 : i32
    %c0_i32_0 = arith.constant 0 : i32
    return %arg0, %c0_i32, %arg1 : i32, i32, i32
  }
  func.func @transform_1(%arg0: i32, %arg1: i32) -> (i32, i32, i32) {
    %c0_i32 = arith.constant 0 : i32
    %c0_i32_0 = arith.constant 0 : i32
    return %arg0, %c0_i32, %arg1 : i32, i32, i32
  }
  func.func @transform_2(%arg0: i32, %arg1: i32) -> (i32, i32) {
    %c0_i32 = arith.constant 0 : i32
    %c0_i32_0 = arith.constant 0 : i32
    %c0_i32_1 = arith.constant 0 : i32
    return %c0_i32, %c0_i32_0 : i32, i32
  }
  func.func @transform_3(%arg0: i32, %arg1: i32) -> (i32, i32) {
    %c0_i32 = arith.constant 0 : i32
    %c0_i32_0 = arith.constant 0 : i32
    %c0_i32_1 = arith.constant 0 : i32
    return %c0_i32, %c0_i32_0 : i32, i32
  }
  func.func @transform_4(%arg0: i32, %arg1: i32) -> (i32, i32) {
    %c0_i32 = arith.constant 0 : i32
    %c0_i32_0 = arith.constant 0 : i32
    %c0_i32_1 = arith.constant 0 : i32
    return %c0_i32, %c0_i32_0 : i32, i32
  }
  func.func @transform_5(%arg0: i32, %arg1: i32) -> (i32, i32) {
    %c0_i32 = arith.constant 0 : i32
    %c0_i32_0 = arith.constant 0 : i32
    %c0_i32_1 = arith.constant 0 : i32
    return %c0_i32, %c0_i32_0 : i32, i32
  }
  func.func @transform_6(%arg0: i32, %arg1: i32) -> i32 {
    %c0_i32 = arith.constant 0 : i32
    %c0_i32_0 = arith.constant 0 : i32
    return %c0_i32 : i32
  }
  func.func @transform_7(%arg0: i32, %arg1: i32) -> (i32, i32, i32) {
    %c0_i32 = arith.constant 0 : i32
    %c0_i32_0 = arith.constant 0 : i32
    return %arg0, %c0_i32, %arg1 : i32, i32, i32
  }
}

</mosaic_0001>

<bundles_post_ra>
// kernel: tpu_custom_call.1
= control target key start
LH: loop header
LB: loop body
LE: loop exit
PB: predicated region body
PF: predicated region fallthrough
CT: control target
= control target key end

     0   :  { %s1099_s0 = inlined_call_operand.vmem [shape: f32[2,4,256], index: 0, kind: input, shape index: {}]   ;;  %s1100_s1 = inlined_call_operand.hbm [shape: f32[2,4,256], index: 1, kind: input, shape index: {}]   ;;  %s1101_s2 = inlined_call_operand.vmem [shape: f32[8,4], index: 2, kind: input, shape index: {}]   ;;  %s1102_s3 = inlined_call_operand.vmem [shape: f32[8,4], index: 3, kind: input, shape index: {}]   ;;  %s1103_s4 = inlined_call_operand.vmem [shape: f32[8,1], index: 4, kind: input, shape index: {}]   ;;  %s1104_s5 = inlined_call_operand.vmem [shape: f32[1,8], index: 5, kind: input, shape index: {}]   ;;  %s1105_s6 = inlined_call_operand.<no memory space> [shape: f32[1], index: 6, kind: input, shape index: {}]   ;;  %s1106_s7 = inlined_call_operand.hbm [shape: f32[2,4,256], index: 7, kind: output, shape index: {}]  }
   0x1   :  { %12 = sst [smem:[#allocation2]] %s1105_s6 }
   0x2   :  { %13 = vsyncpa [#allocation4], 0 }
   0x3   :  { %15 = vsyncpa [#allocation4 + $0x1], 0 }
   0x4   :  { %16 = vsyncpa [#allocation5], 0 }
   0x5   :  { %18 = vsyncpa [#allocation5 + $0x1], 0  ;;  %s949_s26 = smov 0   ;;  %s951_s27 = smov 0  }
   0x6   :  { %s953_s28 = smov 0   ;;  %s955_s29 = smov 0  }
   0x7   :  { %s957_s30 = smov 0   ;;  %s959_s8 = smov 0  }
   0x8 LB: > { %s687_s6 = sadd.s32 4294967295, %s903_s8   ;;  %s688_s9 = sadd.s32 4294967294, %s903_s8   ;;  %s903_s8 = sphi %s959_s8, %s24_s8   ;;  %s899_s30 = sphi %s957_s30, %s1115_s30   ;;  %s895_s29 = sphi %s955_s29, %s1114_s29   ;;  %s891_s28 = sphi %s953_s28, %s1113_s28   ;;  %s887_s27 = sphi %s951_s27, %s1112_s27   ;;  %s883_s26 = sphi %s949_s26, %s1111_s26  }
   0x9   : > { %s36_s10 = sadd.s32 1, %s899_s30  ;;  %s73_s11 = sadd.s32 1, %s891_s28 }
   0xa   : > { %p38_p0 = scmp.ge.s32.totalorder %s36_s10, 2  ;;  %p80_p1 = scmp.ne.s32.totalorder %s891_s28, %s887_s27 }
   0xb   : > { %p81_p2 = scmp.eq.s32.totalorder %s903_s8, 0  ;;  %p86_p3 = scmp.ne.s32.totalorder %s887_s27, %s883_s26 }
   0xc   : > { %s1117_s10 = smov (%p38_p0, %s36_s10), 0  ;;  %p87_p5 = scmp.eq.s32.totalorder %s687_s6, 0 }
   0xd   : > { %p990_p4 = por %p81_p2, %p80_p1  ;;  %s68_s13 = ssub.s32 %s899_s30, %s1117_s10 }
   0xe   : > { %p217_p6 = scmp.eq.s32.totalorder %s687_s6, 1  ;;  %p71_p7 = scmp.eq.s32.totalorder %s68_s13, 0 }
   0xf   : > { %p996_p8 = por %p87_p5, %p86_p3  ;;  %p223_p10 = scmp.eq.s32.totalorder %s688_s9, 1 }
  0x10   : > { %p1000_p9 = por %p217_p6, %p80_p1  ;;  %p690_p12 = scmp.ge.s32.totalorder %s903_s8, 2 }
  0x11   : > { %s1005_s16 = scalar_select %p71_p7, %s891_s28, %s73_s11  }
  0x12   : > { %p1007_p11 = por %p223_p10, %p86_p3  ;;  %p731_p13 = scmp.lt.s32.totalorder %s903_s8, 2 }
  0x13   : > { %s271_s18 = sand.u32 1, %s891_s28   ;;  %s716_s20 = sshll.u32 %s899_s30, 3 }
  0x14   : > { %s691_s19 = sshll.u32 %s271_s18, 3  ;;  %s282_s23 = scalar_lea.hbm %s1100_s1, %s716_s20 }
  0x15   : > { %s275_s24 = scalar_lea.vmem [#allocation3], %s691_s19  ;;  %s284_s6 = sshll.u32 %s282_s23, 4  ;;  %s285_s6 = int_to_ptr.hbm [resolvable:$true] %s284_s6 }
  0x16   : > { %s286_s25 = sshll.u32 %s275_s24, 4  ;;  %p724_p0 = pnand %p731_p13, %p990_p4  ;;  %s287_s25 = int_to_ptr.vmem [resolvable:$true] %s286_s25 }
  0x17   : > { %p694_p1 = scmp.ge.s32.totalorder %s903_s8, 1  ;;  %p291_p2 = scmp.lt.s32.totalorder %s903_s8, 3 }
  0x18   : > { %s272_s9 = scalar_lea.sflag [#allocation4], %s271_s18 }
  0x19   : > { %726 = dma.hbm_to_vmem [thread:$0]  (!%p724_p0), %s285_s6, 128, %s287_s25, %s272_s9  }
  0x1a   : > { %p292_p3 = pnand %p694_p1, %p291_p2 }
  0x1b   : > { %s1023_s11 = sand.u32 (!%p292_p3), 1, %s887_s27  }
  0x1c   : > { %295 = sbr.rel (%p292_p3) target bundleno = 358 (0x166), region = 48  ;;  %s695_s13 = sshll.u32 (!%p292_p3), %s1023_s11, 3 }
  0x1d   : > { %s298_s19 = scalar_lea.sflag (!%p292_p3), [#allocation4], %s1023_s11  ;;  %s301_s20 = scalar_lea.vmem (!%p292_p3), [#allocation3], %s695_s13 }
  0x21   : > { %874 = dma.done.wait (%p996_p8), %s298_s19, 128  }
  0x22   : > { %876 = vsyncadd (%p996_p8), %s298_s19, 4294967168  ;;  %p343_p4 = scmp.lt.s32.totalorder %s895_s29, 1  ;;  %v905_v0 = vmov 0   ;;  %v1035_v1 = vld [vmem:[%s301_s20] sm:$0xff]  ;;  %v462_v2 = vld [vmem:[%s1103_s4] sm:$0xff]  ;;  %vm366_vm0 = vcmask 1043456  }
  0x23   : > { %782 = vset.pattern.permute.xlu0 %v905_v0  ;;  %359 = vst [vmem:[#allocation1] ss:$2 sm:$0xff] %v1035_v1  ;;  %v356_v4 = vld [vmem:[%s1102_s3] sm:$0xff]  ;;  %vm362_vm1 = vcmask 31744   ;;  %vm475_vm2 = vcmask 64512   ;;  %s718_s21 = sshll.u32 %s895_s29, 3 }
  0x24   : > { %s344_s12 = scalar_select %p343_p4, %s895_s29, 1  ;;  %465 = vperm.xlu0 %782, %v462_v2   ;;  %v354_v7 = vld [vmem:[%s1101_s2] sm:$0xff] }
  0x25   : > { %v472_v21 = vld [vmem:[%s1104_s5] sm:$0x1]  ;;  %s580_s24 = scalar_lea.hbm %s1106_s7, %s718_s21  ;;  %s341_s29 = scalar_lea.vmem [#allocation6], %s695_s13 }
  0x26   : > { %s717_s18 = sshll.u32 %s344_s12, 3  ;;  %s584_s25 = sshll.u32 %s580_s24, 4  ;;  %s585_s25 = int_to_ptr.hbm [resolvable:$true] %s584_s25 }
  0x27   : > { %s350_s14 = scalar_lea.vmem %s1099_s0, %s717_s18  ;;  %s473_s18 = sld [smem:[#allocation2]] }
  0x28   : > { %v355_v3 = vld [vmem:[%s350_s14] sm:$0xff]  ;;  %s582_s14 = sshll.u32 %s341_s29, 4  ;;  %s567_s6 = scalar_lea.sflag [#allocation5], %s1023_s11  ;;  %s583_s14 = int_to_ptr.vmem [resolvable:$true] %s582_s14 }
  0x29   : > { %s835_s9 = sshra.s32 %s585_s25, 4  ;;  %s841_s13 = scalar_lea.hbm %s1106_s7, 16  ;;  %s836_s9 = int_to_ptr.hbm [resolvable:$true] %s835_s9 }
  0x2a   : > { %v360_v5 = vld.sshfl [vmem:[#allocation1] sm:$0xff pattern:$0x75316420]  ;;  %v361_v6 = vld.sshfl [vmem:[#allocation1 + $0x8] sm:$0xff pattern:$0x75316420]  ;;  %p842_p8 = scmp.lt.s32.totalorder %s836_s9, %s1106_s7 }
  0x2b   : > { %412 = vst [vmem:[#allocation1] ss:$2 sm:$0xff] %v355_v3  ;;  %699 = vmatpush.msk.msra.mxu0 %vm366_vm0, %v360_v5  ;;  %701 = vmatpush.msk.msra.mxu1 %vm366_vm0, %v361_v6  ;;  %s837_s19 = scalar_lea.hbm %s836_s9, 8 }
  0x2c   : > { %700 = vmatmul.msk.f32.vlgmr.msra.gmra.mxu0 %vm362_vm1, %v356_v4  ;;  %702 = vmatmul.msk.f32.vlgmr.msra.gmra.mxu1 %vm362_vm1, %v356_v4  ;;  %p838_p5 = scmp.ne.s32.totalorder %s836_s9, %s837_s19  ;;  %p843_p10 = scmp.lt.s32.totalorder %s841_s13, %s837_s19 }
  0x2d   : > { %v474_v22 = vstv %s473_s18 }
  0x2e   : > { %p839_p6 = pnand %p838_p5, %p1000_p9  ;;  %p844_p13 = por %p843_p10, %p842_p8 }
  0x30   : > { %p840_p7 = pneg %p839_p6 }
  0x32   : > { %v413_v8 = vld.sshfl [vmem:[#allocation1] sm:$0xff pattern:$0x75316420]  ;;  %v414_v9 = vld.sshfl [vmem:[#allocation1 + $0x8] sm:$0xff pattern:$0x75316420]  ;;  %p845_p0 = pnand %p844_p13, %p840_p7 }
  0x33   : > { %703 = vmatpush.msk.msra.mxu2 %vm366_vm0, %v413_v8  ;;  %705 = vmatpush.msk.msra.mxu3 %vm366_vm0, %v414_v9 }
  0x34   : > { %704 = vmatmul.msk.f32.vlgmr.msra.gmra.mxu2 %vm362_vm1, %v354_v7  ;;  %706 = vmatmul.msk.f32.vlgmr.msra.gmra.mxu3 %vm362_vm1, %v354_v7 }
  0x96   : > { %v466_v12 = vpop.permute.xlu0 %465 }
  0xa9   : > { %v388_v10 = vpop.f32.mrf.mxu0  ;;  %v408_v11 = vpop.f32.mrf.mxu1 }
  0xb7   : > { %v439_v13 = vpop.f32.mrf.mxu2  ;;  %v459_v14 = vpop.f32.mrf.mxu3 }
  0xb8   : > { %v440_v15 = vadd.f32 %v439_v13, %v388_v10  ;;  %v460_v16 = vadd.f32 %v459_v14, %v408_v11 }
  0xba   : > { %v468_v17 = vadd.f32 %v466_v12, %v440_v15  ;;  %v469_v18 = vadd.f32 %v466_v12, %v460_v16 }
  0xbc   : > { %v470_v19 = vmax.f32 %v468_v17, 0.0  ;;  %v471_v20 = vmax.f32 %v469_v18, 0.0 }
  0xbe   : > { %494 = vmatpush.msrb.mxu0 %v470_v19  ;;  %514 = vmatpush.msrb.mxu1 %v471_v20 }
  0xbf   : > { %707 = vmatmul.msk.f32.vlgmr.msrb.gmra.mxu0 %vm475_vm2, %v472_v21  ;;  %708 = vmatmul.msk.f32.vlgmr.msrb.gmra.mxu1 %vm475_vm2, %v472_v21 }
 0x13c   : > { %v496_v23 = vpop.f32.mrf.mxu0  ;;  %v516_v24 = vpop.f32.mrf.mxu1 }
 0x13d   : > { %v497_v25 = vadd.f32 %v496_v23, %v474_v22  ;;  %v517_v26 = vadd.f32 %v516_v24, %v474_v22 }
 0x13f   : > { %v709_v27 = vmul.f32 -1.442695, %v497_v25  ;;  %v710_v28 = vmul.f32 -1.442695, %v517_v26 }
 0x141   : > { %783 = vpow2.f32 %v709_v27 }
 0x142   : > { %785 = vpow2.f32 %v710_v28 }
 0x147   : > { %v784_v29 = vpop.eup %783 }
 0x148   : > { %v786_v30 = vpop.eup %785  ;;  %v525_v31 = vadd.f32 1.0, %v784_v29 }
 0x149   : > { %v526_v32 = vadd.f32 1.0, %v786_v30 }
 0x14a   : > { %787 = vrcp.f32 %v525_v31  ;;  %v538_v40 = vand.u32 2147483648, %v525_v31  ;;  %v536_v42 = vand.u32 2147483647, %v525_v31  ;;  %vm532_vm5 = vweird.f32 %v525_v31 }
 0x14b   : > { %789 = vrcp.f32 %v526_v32  ;;  %v553_v41 = vand.u32 2147483648, %v526_v32  ;;  %v551_v44 = vand.u32 2147483647, %v526_v32  ;;  %vm547_vm7 = vweird.f32 %v526_v32 }
 0x14c   : > { %v539_v47 = vor.u32 1.1754944e-38, %v538_v40  ;;  %vm537_vm9 = vcmp.eq.f32.partialorder %v536_v42, 8.507059e+37 }
 0x14d   : > { %v554_v48 = vor.u32 1.1754944e-38, %v553_v41  ;;  %vm552_vm10 = vcmp.eq.f32.partialorder %v551_v44, 8.507059e+37 }
 0x150   : > { %v788_v33 = vpop.eup %787 }
 0x151   : > { %v790_v34 = vpop.eup %789  ;;  %v528_v35 = vmul.f32 %v788_v33, %v525_v31  ;;  %vm533_vm3 = vweird.f32 %v788_v33 }
 0x152   : > { %v543_v36 = vmul.f32 %v790_v34, %v526_v32  ;;  %vm548_vm4 = vweird.f32 %v790_v34  ;;  %vm534_vm6 = vmor %vm532_vm5, %vm533_vm3 }
 0x153   : > { %v529_v37 = vsub.f32 1.0, %v528_v35  ;;  %vm549_vm8 = vmor %vm547_vm7, %vm548_vm4 }
 0x154   : > { %v544_v38 = vsub.f32 1.0, %v543_v36 }
 0x155   : > { %v530_v39 = vmul.f32 %v788_v33, %v529_v37 }
 0x156   : > { %v545_v43 = vmul.f32 %v790_v34, %v544_v38 }
 0x157   : > { %v531_v45 = vadd.f32 %v788_v33, %v530_v39 }
 0x158   : > { %v546_v46 = vadd.f32 %v790_v34, %v545_v43 }
 0x159   : > { %v535_v49 = vsel %vm534_vm6, %v788_v33, %v531_v45 }
 0x15a   : > { %v550_v50 = vsel %vm549_vm8, %v790_v34, %v546_v46  ;;  %v540_v51 = vsel %vm537_vm9, %v539_v47, %v535_v49 }
 0x15b   : > { %v555_v52 = vsel %vm552_vm10, %v554_v48, %v550_v50  ;;  %v557_v54 = vperm.slane %v540_v51, 0 }
 0x15c   : > { %v558_v53 = vperm.slane %v555_v52, 0 }
 0x15e   : > { %v561_v55 = vrot.slane %v558_v53, 4 }
 0x160   : > { %v562_v56 = vsel %vm366_vm0, %v557_v54, %v561_v55 }
 0x161   : > { %v564_v57 = vmul.f32 %v562_v56, %v1035_v1 }
 0x163   : > { %565 = vst [vmem:[%s341_s29] sm:$0xff] %v564_v57 }
 0x164   : > { %848 = shalt.err (!%p845_p0)
}
 0x165   : > { %721 = dma.vmem_to_hbm [thread:$0]  (%p1000_p9), %s583_s14, 128, %s585_s25, %s567_s6  }
 0x166 PF: > { %s596_s11 = sand.u32 1, %s883_s26   ;;  %p728_p1 = pnand %p690_p12, %p1007_p11 }
 0x167   : > { %s597_s22 = scalar_lea.sflag [#allocation5], %s596_s11 }
 0x168   : > { %p729_p2 = pneg %p728_p1 }
 0x16a   : > { %878 = dma.done.wait (%p729_p2), %s597_s22, 128  }
 0x16b   : > { %880 = vsyncadd (%p729_p2), %s597_s22, 4294967168  ;;  %s24_s8 = sadd.s32 1, %s903_s8   ;;  %s1111_s26 = smov %s887_s27 }
 0x16c   : > { %p21_p3 = scmp.ge.s32.totalorder %s24_s8, 4   ;;  %s1112_s27 = smov %s891_s28 }
 0x16d   : > { %s1113_s28 = smov %s1005_s16  ;;  %s1114_s29 = smov %s899_s30 }
 0x16e   : > { %s1115_s30 = smov %s1117_s10  ;;  %23 = sbr.rel (!%p21_p3) target bundleno = 8 (0x8), region = 96 }
 0x173   :  { %603 = vsyncpa [#allocation4], 1 }
 0x174   :  { %605 = vsyncpa [#allocation4 + $0x1], 1 }
 0x175   :  { %606 = vsyncpa [#allocation5], 1 }
 0x176   :  { %608 = vsyncpa [#allocation5 + $0x1], 1 }

// kernel: tpu_custom_call.1
= control target key start
LH: loop header
LB: loop body
LE: loop exit
PB: predicated region body
PF: predicated region fallthrough
CT: control target
= control target key end

     0   :  { %s1099_s0 = inlined_call_operand.vmem [shape: f32[2,4,256], index: 0, kind: input, shape index: {}]   ;;  %s1100_s1 = inlined_call_operand.hbm [shape: f32[2,4,256], index: 1, kind: input, shape index: {}]   ;;  %s1101_s2 = inlined_call_operand.vmem [shape: f32[8,4], index: 2, kind: input, shape index: {}]   ;;  %s1102_s3 = inlined_call_operand.vmem [shape: f32[8,4], index: 3, kind: input, shape index: {}]   ;;  %s1103_s4 = inlined_call_operand.vmem [shape: f32[8,1], index: 4, kind: input, shape index: {}]   ;;  %s1104_s5 = inlined_call_operand.vmem [shape: f32[1,8], index: 5, kind: input, shape index: {}]   ;;  %s1105_s6 = inlined_call_operand.<no memory space> [shape: f32[1], index: 6, kind: input, shape index: {}]   ;;  %s1106_s7 = inlined_call_operand.hbm [shape: f32[2,4,256], index: 7, kind: output, shape index: {}]  }
   0x1   :  { %12 = sst [smem:[#allocation2]] %s1105_s6 }
   0x2   :  { %13 = vsyncpa [#allocation4], 0 }
   0x3   :  { %15 = vsyncpa [#allocation4 + $0x1], 0 }
   0x4   :  { %16 = vsyncpa [#allocation5], 0 }
   0x5   :  { %18 = vsyncpa [#allocation5 + $0x1], 0  ;;  %s949_s26 = smov 0   ;;  %s951_s27 = smov 0  }
   0x6   :  { %s953_s28 = smov 0   ;;  %s955_s29 = smov 0  }
   0x7   :  { %s957_s30 = smov 0   ;;  %s959_s8 = smov 0  }
   0x8 LB: > { %s687_s6 = sadd.s32 4294967295, %s903_s8   ;;  %s688_s9 = sadd.s32 4294967294, %s903_s8   ;;  %s903_s8 = sphi %s959_s8, %s24_s8   ;;  %s899_s30 = sphi %s957_s30, %s1115_s30   ;;  %s895_s29 = sphi %s955_s29, %s1114_s29   ;;  %s891_s28 = sphi %s953_s28, %s1113_s28   ;;  %s887_s27 = sphi %s951_s27, %s1112_s27   ;;  %s883_s26 = sphi %s949_s26, %s1111_s26  }
   0x9   : > { %s36_s10 = sadd.s32 1, %s899_s30  ;;  %s73_s11 = sadd.s32 1, %s891_s28 }
   0xa   : > { %p38_p0 = scmp.ge.s32.totalorder %s36_s10, 2  ;;  %p80_p1 = scmp.ne.s32.totalorder %s891_s28, %s887_s27 }
   0xb   : > { %p81_p2 = scmp.eq.s32.totalorder %s903_s8, 0  ;;  %p86_p3 = scmp.ne.s32.totalorder %s887_s27, %s883_s26 }
   0xc   : > { %s1117_s10 = smov (%p38_p0, %s36_s10), 0  ;;  %p87_p5 = scmp.eq.s32.totalorder %s687_s6, 0 }
   0xd   : > { %p990_p4 = por %p81_p2, %p80_p1  ;;  %s68_s13 = ssub.s32 %s899_s30, %s1117_s10 }
   0xe   : > { %p217_p6 = scmp.eq.s32.totalorder %s687_s6, 1  ;;  %p71_p7 = scmp.eq.s32.totalorder %s68_s13, 0 }
   0xf   : > { %p996_p8 = por %p87_p5, %p86_p3  ;;  %p223_p10 = scmp.eq.s32.totalorder %s688_s9, 1 }
  0x10   : > { %p1000_p9 = por %p217_p6, %p80_p1  ;;  %p690_p12 = scmp.ge.s32.totalorder %s903_s8, 2 }
  0x11   : > { %s1005_s16 = scalar_select %p71_p7, %s891_s28, %s73_s11  }
  0x12   : > { %p1007_p11 = por %p223_p10, %p86_p3  ;;  %p731_p13 = scmp.lt.s32.totalorder %s903_s8, 2 }
  0x13   : > { %s271_s18 = sand.u32 1, %s891_s28   ;;  %s716_s20 = sshll.u32 %s899_s30, 3 }
  0x14   : > { %s691_s19 = sshll.u32 %s271_s18, 3  ;;  %s282_s23 = scalar_lea.hbm %s1100_s1, %s716_s20 }
  0x15   : > { %s275_s24 = scalar_lea.vmem [#allocation3], %s691_s19  ;;  %s284_s6 = sshll.u32 %s282_s23, 4  ;;  %s285_s6 = int_to_ptr.hbm [resolvable:$true] %s284_s6 }
  0x16   : > { %s286_s25 = sshll.u32 %s275_s24, 4  ;;  %p724_p0 = pnand %p731_p13, %p990_p4  ;;  %s287_s25 = int_to_ptr.vmem [resolvable:$true] %s286_s25 }
  0x17   : > { %p694_p1 = scmp.ge.s32.totalorder %s903_s8, 1  ;;  %p291_p2 = scmp.lt.s32.totalorder %s903_s8, 3 }
  0x18   : > { %s272_s9 = scalar_lea.sflag [#allocation4], %s271_s18 }
  0x19   : > { %726 = dma.hbm_to_vmem [thread:$0]  (!%p724_p0), %s285_s6, 128, %s287_s25, %s272_s9  }
  0x1a   : > { %p292_p3 = pnand %p694_p1, %p291_p2 }
  0x1b   : > { %s1023_s11 = sand.u32 (!%p292_p3), 1, %s887_s27  }
  0x1c   : > { %295 = sbr.rel (%p292_p3) target bundleno = 358 (0x166), region = 48  ;;  %s695_s13 = sshll.u32 (!%p292_p3), %s1023_s11, 3 }
  0x1d   : > { %s298_s19 = scalar_lea.sflag (!%p292_p3), [#allocation4], %s1023_s11  ;;  %s301_s20 = scalar_lea.vmem (!%p292_p3), [#allocation3], %s695_s13 }
  0x21   : > { %874 = dma.done.wait (%p996_p8), %s298_s19, 128  }
  0x22   : > { %876 = vsyncadd (%p996_p8), %s298_s19, 4294967168  ;;  %p343_p4 = scmp.lt.s32.totalorder %s895_s29, 1  ;;  %v905_v0 = vmov 0   ;;  %v1035_v1 = vld [vmem:[%s301_s20] sm:$0xff]  ;;  %v462_v2 = vld [vmem:[%s1103_s4] sm:$0xff]  ;;  %vm366_vm0 = vcmask 1043456  }
  0x23   : > { %782 = vset.pattern.permute.xlu0 %v905_v0  ;;  %359 = vst [vmem:[#allocation1] ss:$2 sm:$0xff] %v1035_v1  ;;  %v356_v4 = vld [vmem:[%s1102_s3] sm:$0xff]  ;;  %vm362_vm1 = vcmask 31744   ;;  %vm475_vm2 = vcmask 64512   ;;  %s718_s21 = sshll.u32 %s895_s29, 3 }
  0x24   : > { %s344_s12 = scalar_select %p343_p4, %s895_s29, 1  ;;  %465 = vperm.xlu0 %782, %v462_v2   ;;  %v354_v7 = vld [vmem:[%s1101_s2] sm:$0xff] }
  0x25   : > { %v472_v21 = vld [vmem:[%s1104_s5] sm:$0x1]  ;;  %s580_s24 = scalar_lea.hbm %s1106_s7, %s718_s21  ;;  %s341_s29 = scalar_lea.vmem [#allocation6], %s695_s13 }
  0x26   : > { %s717_s18 = sshll.u32 %s344_s12, 3  ;;  %s584_s25 = sshll.u32 %s580_s24, 4  ;;  %s585_s25 = int_to_ptr.hbm [resolvable:$true] %s584_s25 }
  0x27   : > { %s350_s14 = scalar_lea.vmem %s1099_s0, %s717_s18  ;;  %s473_s18 = sld [smem:[#allocation2]] }
  0x28   : > { %v355_v3 = vld [vmem:[%s350_s14] sm:$0xff]  ;;  %s582_s14 = sshll.u32 %s341_s29, 4  ;;  %s567_s6 = scalar_lea.sflag [#allocation5], %s1023_s11  ;;  %s583_s14 = int_to_ptr.vmem [resolvable:$true] %s582_s14 }
  0x29   : > { %s835_s9 = sshra.s32 %s585_s25, 4  ;;  %s841_s13 = scalar_lea.hbm %s1106_s7, 16  ;;  %s836_s9 = int_to_ptr.hbm [resolvable:$true] %s835_s9 }
  0x2a   : > { %v360_v5 = vld.sshfl [vmem:[#allocation1] sm:$0xff pattern:$0x75316420]  ;;  %v361_v6 = vld.sshfl [vmem:[#allocation1 + $0x8] sm:$0xff pattern:$0x75316420]  ;;  %p842_p8 = scmp.lt.s32.totalorder %s836_s9, %s1106_s7 }
  0x2b   : > { %412 = vst [vmem:[#allocation1] ss:$2 sm:$0xff] %v355_v3  ;;  %699 = vmatpush.msk.msra.mxu0 %vm366_vm0, %v360_v5  ;;  %701 = vmatpush.msk.msra.mxu1 %vm366_vm0, %v361_v6  ;;  %s837_s19 = scalar_lea.hbm %s836_s9, 8 }
  0x2c   : > { %700 = vmatmul.msk.f32.vlgmr.msra.gmra.mxu0 %vm362_vm1, %v356_v4  ;;  %702 = vmatmul.msk.f32.vlgmr.msra.gmra.mxu1 %vm362_vm1, %v356_v4  ;;  %p838_p5 = scmp.ne.s32.totalorder %s836_s9, %s837_s19  ;;  %p843_p10 = scmp.lt.s32.totalorder %s841_s13, %s837_s19 }
  0x2d   : > { %v474_v22 = vstv %s473_s18 }
  0x2e   : > { %p839_p6 = pnand %p838_p5, %p1000_p9  ;;  %p844_p13 = por %p843_p10, %p842_p8 }
  0x30   : > { %p840_p7 = pneg %p839_p6 }
  0x32   : > { %v413_v8 = vld.sshfl [vmem:[#allocation1] sm:$0xff pattern:$0x75316420]  ;;  %v414_v9 = vld.sshfl [vmem:[#allocation1 + $0x8] sm:$0xff pattern:$0x75316420]  ;;  %p845_p0 = pnand %p844_p13, %p840_p7 }
  0x33   : > { %703 = vmatpush.msk.msra.mxu2 %vm366_vm0, %v413_v8  ;;  %705 = vmatpush.msk.msra.mxu3 %vm366_vm0, %v414_v9 }
  0x34   : > { %704 = vmatmul.msk.f32.vlgmr.msra.gmra.mxu2 %vm362_vm1, %v354_v7  ;;  %706 = vmatmul.msk.f32.vlgmr.msra.gmra.mxu3 %vm362_vm1, %v354_v7 }
  0x96   : > { %v466_v12 = vpop.permute.xlu0 %465 }
  0xa9   : > { %v388_v10 = vpop.f32.mrf.mxu0  ;;  %v408_v11 = vpop.f32.mrf.mxu1 }
  0xb7   : > { %v439_v13 = vpop.f32.mrf.mxu2  ;;  %v459_v14 = vpop.f32.mrf.mxu3 }
  0xb8   : > { %v440_v15 = vadd.f32 %v439_v13, %v388_v10  ;;  %v460_v16 = vadd.f32 %v459_v14, %v408_v11 }
  0xba   : > { %v468_v17 = vadd.f32 %v466_v12, %v440_v15  ;;  %v469_v18 = vadd.f32 %v466_v12, %v460_v16 }
  0xbc   : > { %v470_v19 = vmax.f32 %v468_v17, 0.0  ;;  %v471_v20 = vmax.f32 %v469_v18, 0.0 }
  0xbe   : > { %494 = vmatpush.msrb.mxu0 %v470_v19  ;;  %514 = vmatpush.msrb.mxu1 %v471_v20 }
  0xbf   : > { %707 = vmatmul.msk.f32.vlgmr.msrb.gmra.mxu0 %vm475_vm2, %v472_v21  ;;  %708 = vmatmul.msk.f32.vlgmr.msrb.gmra.mxu1 %vm475_vm2, %v472_v21 }
 0x13c   : > { %v496_v23 = vpop.f32.mrf.mxu0  ;;  %v516_v24 = vpop.f32.mrf.mxu1 }
 0x13d   : > { %v497_v25 = vadd.f32 %v496_v23, %v474_v22  ;;  %v517_v26 = vadd.f32 %v516_v24, %v474_v22 }
 0x13f   : > { %v709_v27 = vmul.f32 -1.442695, %v497_v25  ;;  %v710_v28 = vmul.f32 -1.442695, %v517_v26 }
 0x141   : > { %783 = vpow2.f32 %v709_v27 }
 0x142   : > { %785 = vpow2.f32 %v710_v28 }
 0x147   : > { %v784_v29 = vpop.eup %783 }
 0x148   : > { %v786_v30 = vpop.eup %785  ;;  %v525_v31 = vadd.f32 1.0, %v784_v29 }
 0x149   : > { %v526_v32 = vadd.f32 1.0, %v786_v30 }
 0x14a   : > { %787 = vrcp.f32 %v525_v31  ;;  %v538_v40 = vand.u32 2147483648, %v525_v31  ;;  %v536_v42 = vand.u32 2147483647, %v525_v31  ;;  %vm532_vm5 = vweird.f32 %v525_v31 }
 0x14b   : > { %789 = vrcp.f32 %v526_v32  ;;  %v553_v41 = vand.u32 2147483648, %v526_v32  ;;  %v551_v44 = vand.u32 2147483647, %v526_v32  ;;  %vm547_vm7 = vweird.f32 %v526_v32 }
 0x14c   : > { %v539_v47 = vor.u32 1.1754944e-38, %v538_v40  ;;  %vm537_vm9 = vcmp.eq.f32.partialorder %v536_v42, 8.507059e+37 }
 0x14d   : > { %v554_v48 = vor.u32 1.1754944e-38, %v553_v41  ;;  %vm552_vm10 = vcmp.eq.f32.partialorder %v551_v44, 8.507059e+37 }
 0x150   : > { %v788_v33 = vpop.eup %787 }
 0x151   : > { %v790_v34 = vpop.eup %789  ;;  %v528_v35 = vmul.f32 %v788_v33, %v525_v31  ;;  %vm533_vm3 = vweird.f32 %v788_v33 }
 0x152   : > { %v543_v36 = vmul.f32 %v790_v34, %v526_v32  ;;  %vm548_vm4 = vweird.f32 %v790_v34  ;;  %vm534_vm6 = vmor %vm532_vm5, %vm533_vm3 }
 0x153   : > { %v529_v37 = vsub.f32 1.0, %v528_v35  ;;  %vm549_vm8 = vmor %vm547_vm7, %vm548_vm4 }
 0x154   : > { %v544_v38 = vsub.f32 1.0, %v543_v36 }
 0x155   : > { %v530_v39 = vmul.f32 %v788_v33, %v529_v37 }
 0x156   : > { %v545_v43 = vmul.f32 %v790_v34, %v544_v38 }
 0x157   : > { %v531_v45 = vadd.f32 %v788_v33, %v530_v39 }
 0x158   : > { %v546_v46 = vadd.f32 %v790_v34, %v545_v43 }
 0x159   : > { %v535_v49 = vsel %vm534_vm6, %v788_v33, %v531_v45 }
 0x15a   : > { %v550_v50 = vsel %vm549_vm8, %v790_v34, %v546_v46  ;;  %v540_v51 = vsel %vm537_vm9, %v539_v47, %v535_v49 }
 0x15b   : > { %v555_v52 = vsel %vm552_vm10, %v554_v48, %v550_v50  ;;  %v557_v54 = vperm.slane %v540_v51, 0 }
 0x15c   : > { %v558_v53 = vperm.slane %v555_v52, 0 }
 0x15e   : > { %v561_v55 = vrot.slane %v558_v53, 4 }
 0x160   : > { %v562_v56 = vsel %vm366_vm0, %v557_v54, %v561_v55 }
 0x161   : > { %v564_v57 = vmul.f32 %v562_v56, %v1035_v1 }
 0x163   : > { %565 = vst [vmem:[%s341_s29] sm:$0xff] %v564_v57 }
 0x164   : > { %848 = shalt.err (!%p845_p0)
}
 0x165   : > { %721 = dma.vmem_to_hbm [thread:$0]  (%p1000_p9), %s583_s14, 128, %s585_s25, %s567_s6  }
 0x166 PF: > { %s596_s11 = sand.u32 1, %s883_s26   ;;  %p728_p1 = pnand %p690_p12, %p1007_p11 }
 0x167   : > { %s597_s22 = scalar_lea.sflag [#allocation5], %s596_s11 }
 0x168   : > { %p729_p2 = pneg %p728_p1 }
 0x16a   : > { %878 = dma.done.wait (%p729_p2), %s597_s22, 128  }
 0x16b   : > { %880 = vsyncadd (%p729_p2), %s597_s22, 4294967168  ;;  %s24_s8 = sadd.s32 1, %s903_s8   ;;  %s1111_s26 = smov %s887_s27 }
 0x16c   : > { %p21_p3 = scmp.ge.s32.totalorder %s24_s8, 4   ;;  %s1112_s27 = smov %s891_s28 }
 0x16d   : > { %s1113_s28 = smov %s1005_s16  ;;  %s1114_s29 = smov %s899_s30 }
 0x16e   : > { %s1115_s30 = smov %s1117_s10  ;;  %23 = sbr.rel (!%p21_p3) target bundleno = 8 (0x8), region = 96 }
 0x173   :  { %603 = vsyncpa [#allocation4], 1 }
 0x174   :  { %605 = vsyncpa [#allocation4 + $0x1], 1 }
 0x175   :  { %606 = vsyncpa [#allocation5], 1 }
 0x176   :  { %608 = vsyncpa [#allocation5 + $0x1], 1 }

</bundles_post_ra>
